<compile_context>
chip_gen: v7x
topology: tpu7x:2x2x1
jax: 0.10.0
libtpu: 0.0.40
codegen_flags: <defaults>
</compile_context>

<pallas_src>
import jax
import jax.numpy as jnp
from jax.experimental import pallas as pl
from jax.experimental.pallas import tpu as pltpu

IN_F = 10
HID_F = 5
OUT_F = 1


def _mlp_kernel(x_ref, w1t_ref, b1_ref, w2_ref, b2_ref, o_ref):
    # x_ref: (tb, 10) natural row-major batch tile (streamed, double-buffered).
    x = x_ref[...]
    # Layer 1: (tb,10) @ (10,5) -> (tb,5), f32 accumulate.
    h = jnp.dot(x, w1t_ref[...], preferred_element_type=jnp.float32)
    h = jnp.maximum(h + b1_ref[...], 0.0)                   # bias (1,5) broadcast + ReLU
    # Layer 2 (N=1): VPU multiply + lane reduce instead of an almost-empty MXU pass.
    y = jnp.sum(h * w2_ref[...], axis=1, keepdims=True)     # (tb, 1)
    o_ref[...] = (y + b2_ref[0, 0]).astype(o_ref.dtype)     # scalar bias from SMEM


def _pick_tb(batch, tb_cap):
    """Batch tile: multiple of 8 (sublane), >= 2 grid steps when possible, <= cap."""
    if batch <= 8:
        return batch                       # single full-extent block
    half = -(-batch // 2)                  # cdiv(batch, 2): at least 2 grid steps
    tb = ((half + 7) // 8) * 8
    return max(8, min(int(tb_cap), tb))


def gera_model_forward(x, w1, b1, w2, b2, *, tb_cap=8192):
    """GeraModel forward.

    x : (B, 10) float32
    w1: (5, 10)  (torch layer1.weight)   b1: (5,)
    w2: (1, 5)   (torch layer2.weight)   b2: (1,)
    returns (B, 1) float32
    """
    B, F = x.shape
    assert F == IN_F
    tb = _pick_tb(B, tb_cap)
    nb = pl.cdiv(B, tb)

    w1t = w1.T.astype(jnp.float32)                    # (10, 5)
    b1r = b1.reshape(1, HID_F).astype(jnp.float32)    # (1, 5)
    w2r = w2.reshape(1, HID_F).astype(jnp.float32)    # (1, 5)
    b2s = b2.reshape(1, 1).astype(jnp.float32)        # (1, 1) scalar -> SMEM

    # Streamed x is the only significant HBM traffic (~40 B/row in + 4 B/row out).
    cost = pl.CostEstimate(
        flops=int((2 * F * HID_F + HID_F + 2 * HID_F) * B),
        transcendentals=0,
        bytes_accessed=int((F + OUT_F) * 4 * B + (F * HID_F + 2 * HID_F + 1) * 4),
    )

    # VMEM: (tb,10) and (tb,1) f32 blocks both lane-pad to 128 -> ~512 B/row/buffer,
    # double-buffered in and out => ~2048*tb bytes + small weights.
    vmem_need = 4 * 512 * tb + (4 << 20)
    vmem_limit = int(min(max(vmem_need, 32 << 20), 40 << 20))

    return pl.pallas_call(
        _mlp_kernel,
        out_shape=jax.ShapeDtypeStruct((B, OUT_F), jnp.float32),
        grid=(nb,),
        in_specs=[
            pl.BlockSpec((tb, F), lambda i: (i, 0)),         # x tile (streamed, pipelined)
            pl.BlockSpec((F, HID_F), lambda i: (0, 0)),      # w1.T (VMEM resident)
            pl.BlockSpec((1, HID_F), lambda i: (0, 0)),      # b1 (resident)
            pl.BlockSpec((1, HID_F), lambda i: (0, 0)),      # w2 row (resident)
            pl.BlockSpec((1, 1), lambda i: (0, 0),
                         memory_space=pltpu.MemorySpace.SMEM),  # b2 scalar
        ],
        out_specs=pl.BlockSpec((tb, OUT_F), lambda i: (i, 0)),
        compiler_params=pltpu.CompilerParams(
            dimension_semantics=("parallel",),
            vmem_limit_bytes=vmem_limit),
        cost_estimate=cost,
    )(x, w1t, b1r, w2r, b2s)


def init_params(key):
    """Deterministic init matching nn.Linear defaults, torch layouts."""
    k1, k2, k3, k4 = jax.random.split(key, 4)
    lim1 = 1.0 / jnp.sqrt(float(IN_F))
    lim2 = 1.0 / jnp.sqrt(float(HID_F))
    w1 = jax.random.uniform(k1, (HID_F, IN_F), jnp.float32, -lim1, lim1)   # layer1.weight
    b1 = jax.random.uniform(k2, (HID_F,), jnp.float32, -lim1, lim1)        # layer1.bias
    w2 = jax.random.uniform(k3, (OUT_F, HID_F), jnp.float32, -lim2, lim2)  # layer2.weight
    b2 = jax.random.uniform(k4, (OUT_F,), jnp.float32, -lim2, lim2)        # layer2.bias
    return w1, b1, w2, b2


def _reference(x, w1, b1, w2, b2):
    return jnp.maximum(x @ w1.T + b1, 0.0) @ w2.T + b2


if __name__ == "__main__":
    key = jax.random.PRNGKey(0)
    kx, kp = jax.random.split(key)
    B = 600
    x = jax.random.normal(kx, (B, IN_F), jnp.float32)
    w1, b1, w2, b2 = init_params(kp)

    ref = _reference(x, w1, b1, w2, b2)

    # Default path: tb = 304, grid = 2 (ragged last tile masked by Pallas).
    out_default = jax.block_until_ready(gera_model_forward(x, w1, b1, w2, b2))
    # Forced small tile: tb = 128, grid = 5 (exercises multi-step pipelining).
    out_small = jax.block_until_ready(
        gera_model_forward(x, w1, b1, w2, b2, tb_cap=128))

    assert out_default.shape == (B, OUT_F)
    assert out_small.shape == (B, OUT_F)
    assert jnp.allclose(out_default, ref, atol=1e-5, rtol=1e-5)
    assert jnp.allclose(out_small, ref, atol=1e-5, rtol=1e-5)

    print("KERNEL_OK")
</pallas_src>

<mosaic_0001>
module attributes {stable_mosaic.version = 11 : i64} {
  func.func @_mlp_kernel(%arg0: i32, %arg1: memref<304x10xf32, #tpu.memory_space<vmem>>, %arg2: memref<10x5xf32, #tpu.memory_space<vmem>>, %arg3: memref<1x5xf32, #tpu.memory_space<vmem>>, %arg4: memref<1x5xf32, #tpu.memory_space<vmem>>, %arg5: memref<1x1xf32, #tpu.memory_space<smem>>, %arg6: memref<304x1xf32, #tpu.memory_space<vmem>>) attributes {dimension_semantics = [#tpu.dimension_semantics<parallel>], iteration_bounds = array<i64: 2>, scalar_prefetch = 0 : i64, scratch_operands = 0 : i64, tpu.core_type = #tpu.core_type<tc>, window_params = [{transform_indices = @transform_0, window_bounds = array<i64: 304, 10>}, {pipeline_mode = #tpu.pipeline_mode<synchronous>, transform_indices = @transform_1, window_bounds = array<i64: 10, 5>}, {pipeline_mode = #tpu.pipeline_mode<synchronous>, transform_indices = @transform_2, window_bounds = array<i64: 1, 5>}, {pipeline_mode = #tpu.pipeline_mode<synchronous>, transform_indices = @transform_3, window_bounds = array<i64: 1, 5>}, {transform_indices = @transform_4, window_bounds = array<i64: 1, 1>}, {transform_indices = @transform_5, window_bounds = array<i64: 304, 1>}]} {
    %c0 = arith.constant 0 : index
    %c0_0 = arith.constant 0 : index
    %0 = vector.load %arg1[%c0, %c0_0] : memref<304x10xf32, #tpu.memory_space<vmem>>, vector<304x10xf32>
    %c0_1 = arith.constant 0 : index
    %c0_2 = arith.constant 0 : index
    %1 = vector.load %arg2[%c0_1, %c0_2] : memref<10x5xf32, #tpu.memory_space<vmem>>, vector<10x5xf32>
    %cst = arith.constant dense<0.000000e+00> : vector<304x5xf32>
    %2 = tpu.matmul %0, %1, %cst {dimension_numbers = #tpu.dot_dimension_numbers<[1], [0], [0], [1], [0, 0, 1, 1], [], []>} : vector<304x10xf32>, vector<10x5xf32>, vector<304x5xf32> -> vector<304x5xf32>
    %c0_3 = arith.constant 0 : index
    %c0_4 = arith.constant 0 : index
    %3 = vector.load %arg3[%c0_3, %c0_4] : memref<1x5xf32, #tpu.memory_space<vmem>>, vector<1x5xf32>
    %4 = vector.broadcast %3 : vector<1x5xf32> to vector<304x5xf32>
    %5 = arith.addf %2, %4 : vector<304x5xf32>
    %cst_5 = arith.constant 0.000000e+00 : f32
    %6 = vector.broadcast %cst_5 : f32 to vector<304x5xf32>
    %7 = arith.maximumf %5, %6 : vector<304x5xf32>
    %c0_6 = arith.constant 0 : index
    %c0_7 = arith.constant 0 : index
    %8 = vector.load %arg4[%c0_6, %c0_7] : memref<1x5xf32, #tpu.memory_space<vmem>>, vector<1x5xf32>
    %9 = vector.broadcast %8 : vector<1x5xf32> to vector<304x5xf32>
    %10 = arith.mulf %7, %9 : vector<304x5xf32>
    %cst_8 = arith.constant dense<0.000000e+00> : vector<304xf32>
    %11 = vector.multi_reduction <add>, %10, %cst_8 [1] : vector<304x5xf32> to vector<304xf32>
    %12 = vector.shape_cast %11 : vector<304xf32> to vector<304x1xf32>
    %c0_9 = arith.constant 0 : index
    %c0_10 = arith.constant 0 : index
    %13 = memref.load %arg5[%c0_9, %c0_10] : memref<1x1xf32, #tpu.memory_space<smem>>
    %14 = vector.broadcast %13 : f32 to vector<304x1xf32>
    %15 = arith.addf %12, %14 : vector<304x1xf32>
    %c0_11 = arith.constant 0 : index
    %c0_12 = arith.constant 0 : index
    %16 = vector.load %arg6[%c0_11, %c0_12] : memref<304x1xf32, #tpu.memory_space<vmem>>, vector<304x1xf32>
    tpu.vector_store %arg6[%c0_11, %c0_12], %15 {strides = array<i32>} : memref<304x1xf32, #tpu.memory_space<vmem>>, vector<304x1xf32>,
    return
  }
  func.func @transform_0(%arg0: i32) -> (i32, i32) {
    %c0_i32 = arith.constant 0 : i32
    %c0_i32_0 = arith.constant 0 : i32
    return %arg0, %c0_i32 : i32, i32
  }
  func.func @transform_1(%arg0: i32) -> (i32, i32) {
    %c0_i32 = arith.constant 0 : i32
    %c0_i32_0 = arith.constant 0 : i32
    %c0_i32_1 = arith.constant 0 : i32
    return %c0_i32, %c0_i32_0 : i32, i32
  }
  func.func @transform_2(%arg0: i32) -> (i32, i32) {
    %c0_i32 = arith.constant 0 : i32
    %c0_i32_0 = arith.constant 0 : i32
    %c0_i32_1 = arith.constant 0 : i32
    return %c0_i32, %c0_i32_0 : i32, i32
  }
  func.func @transform_3(%arg0: i32) -> (i32, i32) {
    %c0_i32 = arith.constant 0 : i32
    %c0_i32_0 = arith.constant 0 : i32
    %c0_i32_1 = arith.constant 0 : i32
    return %c0_i32, %c0_i32_0 : i32, i32
  }
  func.func @transform_4(%arg0: i32) -> (i32, i32) {
    %c0_i32 = arith.constant 0 : i32
    %c0_i32_0 = arith.constant 0 : i32
    %c0_i32_1 = arith.constant 0 : i32
    return %c0_i32, %c0_i32_0 : i32, i32
  }
  func.func @transform_5(%arg0: i32) -> (i32, i32) {
    %c0_i32 = arith.constant 0 : i32
    %c0_i32_0 = arith.constant 0 : i32
    return %arg0, %c0_i32 : i32, i32
  }
}

</mosaic_0001>

<bundles_post_ra>
// kernel: tpu_custom_call.1
= control target key start
LH: loop header
LB: loop body
LE: loop exit
PB: predicated region body
PF: predicated region fallthrough
CT: control target
= control target key end

     0   :  { %s2238_s0 = inlined_call_operand.vmem [shape: f32[600,10], index: 0, kind: input, shape index: {}]   ;;  %s2239_s1 = inlined_call_operand.vmem [shape: f32[10,5], index: 1, kind: input, shape index: {}]   ;;  %s2240_s2 = inlined_call_operand.vmem [shape: f32[1,5], index: 2, kind: input, shape index: {}]   ;;  %s2241_s3 = inlined_call_operand.vmem [shape: f32[1,5], index: 3, kind: input, shape index: {}]   ;;  %s2242_s4 = inlined_call_operand.<no memory space> [shape: f32[1,1], index: 4, kind: input, shape index: {}]   ;;  %s2243_s5 = inlined_call_operand.vmem [shape: f32[600,1], index: 5, kind: output, shape index: {}]  }
   0x1   :  { %10 = sst [smem:[#allocation2]] %s2242_s4 }
   0x2   :  { %s1695_s20 = smov 0   ;;  %s1697_s21 = smov 0  }
   0x3   :  { %s1699_s22 = smov 0  }
   0x4 LB: > { %s1708_s4 = sadd.s32 4294967295, %s1627_s22   ;;  %s1710_s23 = sadd.s32 1, %s1627_s22   ;;  %s1627_s22 = sphi %s1699_s22, %s2252_s22   ;;  %s1623_s21 = sphi %s1697_s21, %s2251_s21   ;;  %s1619_s20 = sphi %s1695_s20, %s2250_s20  }
   0x5   : > { %s130_s24 = ssub.s32 %s1627_s22, %s1710_s23  ;;  %s133_s25 = sadd.s32 1, %s1623_s21 }
   0x6   : > { %p131_p0 = scmp.eq.s32.totalorder %s130_s24, 0  ;;  %p143_p1 = scmp.ne.s32.totalorder %s1623_s21, %s1619_s20 }
   0x7   : > { %p144_p2 = scmp.eq.s32.totalorder %s1708_s4, 1  ;;  %p1313_p3 = scmp.ge.s32.totalorder %s1627_s22, 1 }
   0x8   : > { %s1718_s26 = scalar_select %p131_p0, %s1623_s21, %s133_s25  }
   0x9   : > { %p1720_p4 = por %p144_p2, %p143_p1  ;;  %p197_p5 = scmp.lt.s32.totalorder %s1627_s22, 3 }
   0xb   : > { %p198_p6 = pnand %p1313_p3, %p197_p5 }
   0xc   : > { %v285_v0 = vld [vmem:[%s2239_s1] sm:$0xff] (!%p198_p6)  ;;  %v286_v1 = vld [vmem:[%s2239_s1 + $0x8] sm:$0x3] (!%p198_p6)  ;;  %vm409_vm0 = vcmask (!%p198_p6), 1041408   ;;  %s1731_s7 = smul.u32 (!%p198_p6), 38, %s1708_s4  ;;  %vm1661_vm1 = vmmov (!%p198_p6), 1  }
   0xd   : > { %201 = sbr.rel (%p198_p6) target bundleno = 534 (0x216), region = 40  ;;  %v1470_v2 = vpack.c.bf16 (!%p198_p6), %v286_v1, %v285_v0  ;;  %vm1471_vm2 = vmpackc.low (!%p198_p6), %vm409_vm0, %vm1661_vm1  ;;  %vm294_vm3 = vcmask (!%p198_p6), 80896   ;;  %v1819_v41 = vld [vmem:[%s2240_s2] ss:$0 sm:$0xff] (!%p198_p6)  ;;  %vm751_vm4 = vcmask (!%p198_p6), 39936   ;;  %s866_s17 = sld [smem:[#allocation2]] (!%p198_p6) }
   0xe   : > { %p233_p7 = scmp.lt.s32.totalorder (!%p198_p6), %s1731_s7, 74  ;;  %v1828_v50 = vld [vmem:[%s2241_s3] ss:$0 sm:$0xff] (!%p198_p6)  ;;  %s225_s18 = sand.u32 (!%p198_p6), 1, %s1619_s20   ;;  %vm906_vm5 = vcmask (!%p198_p6), 7168  }
   0xf   : > { %1472 = vmatprep.subr.msk.bf16.mxu0 (!%p198_p6), %vm1471_vm2, %v1470_v2  ;;  %1476 = vmatprep.subr.msk.bf16.mxu1 (!%p198_p6), %vm1471_vm2, %v1470_v2  ;;  %s1478_s19 = smul.u32 (!%p198_p6), 304, %s225_s18 }
  0x10   : > { %1475 = vmatpush3.bf16.msk.msra.mxu0 (!%p198_p6), %vm1471_vm2, %v1470_v2  ;;  %1477 = vmatpush3.bf16.msk.msra.mxu1 (!%p198_p6), %vm1471_vm2, %v1470_v2 }
  0x11   : > { %s1975_s22 = scalar_lea.vmem (!%p198_p6), [#allocation3], %s1478_s19  }
  0x14   : > { %s234_s8 = scalar_select %p233_p7, %s1731_s7, 74 }
  0x15   : > { %s953_s20 = ssub.s32 (%p1720_p4), 75, %s1731_s7  ;;  %s1368_s24 = smul.u32 (%p1720_p4), 304, %s1708_s4 }
  0x16   : > { %s1314_s9 = sshll.u32 %s234_s8, 3  ;;  %p954_p8 = scmp.lt.s32.totalorder (%p1720_p4), %s953_s20, 38 }
  0x17   : > { %s1738_s12 = scalar_lea.vmem %s2238_s0, %s1314_s9  ;;  %s2096_s29 = scalar_lea.vmem (%p1720_p4), %s2243_s5, %s1368_s24  }
  0x18   : > { %v247_v3 = vld [vmem:[%s1738_s12] sm:$0xff]  ;;  %v248_v5 = vld [vmem:[%s1738_s12 + $0x8] sm:$0xff]  ;;  %v249_v7 = vld [vmem:[%s1738_s12 + $0x10] sm:$0xff] }
  0x19   : > { %v267_v4 = vld [vmem:[%s1738_s12 + $0xa0] sm:$0xff]  ;;  %1413 = vmatprep.mubr.msk.f32.mxu0 %vm294_vm3, %v247_v3  ;;  %v268_v6 = vld [vmem:[%s1738_s12 + $0xa8] sm:$0xff]  ;;  %v269_v8 = vld [vmem:[%s1738_s12 + $0xb0] sm:$0xff] }
  0x1a   : > { %1443 = vmatprep.mubr.msk.f32.mxu1 %vm294_vm3, %v267_v4  ;;  %1414 = vmatmul.mubr.msk.f32.vlgmr.msra.gmra.mrb[0].mxu0 %vm294_vm3, %v248_v5  ;;  %v250_v9 = vld [vmem:[%s1738_s12 + $0x18] sm:$0xff]  ;;  %v251_v11 = vld [vmem:[%s1738_s12 + $0x20] sm:$0xff]  ;;  %v252_v13 = vld [vmem:[%s1738_s12 + $0x28] sm:$0xff] }
  0x1b   : > { %1444 = vmatmul.mubr.msk.f32.vlgmr.msra.gmra.mrb[0].mxu1 %vm294_vm3, %v268_v6  ;;  %1416 = vmatprep.mubr.msk.f32.mxu0 %vm294_vm3, %v249_v7  ;;  %v270_v10 = vld [vmem:[%s1738_s12 + $0xb8] sm:$0xff]  ;;  %v271_v12 = vld [vmem:[%s1738_s12 + $0xc0] sm:$0xff]  ;;  %v272_v14 = vld [vmem:[%s1738_s12 + $0xc8] sm:$0xff] }
  0x1c   : > { %1446 = vmatprep.mubr.msk.f32.mxu1 %vm294_vm3, %v269_v8  ;;  %v253_v15 = vld [vmem:[%s1738_s12 + $0x30] sm:$0xff]  ;;  %v254_v17 = vld [vmem:[%s1738_s12 + $0x38] sm:$0xff]  ;;  %v255_v19 = vld [vmem:[%s1738_s12 + $0x40] sm:$0xff] }
  0x1d   : > { %v273_v16 = vld [vmem:[%s1738_s12 + $0xd0] sm:$0xff]  ;;  %v274_v18 = vld [vmem:[%s1738_s12 + $0xd8] sm:$0xff]  ;;  %v275_v20 = vld [vmem:[%s1738_s12 + $0xe0] sm:$0xff] }
  0x1e   : > { %1417 = vmatmul.mubr.msk.f32.gmra.mrb[2].mxu0 %vm294_vm3, %v250_v9  ;;  %v256_v21 = vld [vmem:[%s1738_s12 + $0x48] sm:$0xff]  ;;  %v257_v23 = vld [vmem:[%s1738_s12 + $0x50] sm:$0xff]  ;;  %v258_v25 = vld [vmem:[%s1738_s12 + $0x58] sm:$0xff] }
  0x1f   : > { %1447 = vmatmul.mubr.msk.f32.gmra.mrb[2].mxu1 %vm294_vm3, %v270_v10  ;;  %1419 = vmatprep.mubr.msk.f32.mxu0 %vm294_vm3, %v251_v11  ;;  %v276_v22 = vld [vmem:[%s1738_s12 + $0xe8] sm:$0xff]  ;;  %v277_v24 = vld [vmem:[%s1738_s12 + $0xf0] sm:$0xff]  ;;  %v278_v26 = vld [vmem:[%s1738_s12 + $0xf8] sm:$0xff] }
  0x20   : > { %1449 = vmatprep.mubr.msk.f32.mxu1 %vm294_vm3, %v271_v12  ;;  %v259_v27 = vld [vmem:[%s1738_s12 + $0x60] sm:$0xff]  ;;  %v260_v29 = vld [vmem:[%s1738_s12 + $0x68] sm:$0xff]  ;;  %v261_v31 = vld [vmem:[%s1738_s12 + $0x70] sm:$0xff] }
  0x21   : > { %v279_v28 = vld [vmem:[%s1738_s12 + $0x100] sm:$0xff]  ;;  %v280_v30 = vld [vmem:[%s1738_s12 + $0x108] sm:$0xff]  ;;  %v281_v32 = vld [vmem:[%s1738_s12 + $0x110] sm:$0xff] }
  0x22   : > { %1420 = vmatmul.mubr.msk.f32.gmra.mrb[4].mxu0 %vm294_vm3, %v252_v13  ;;  %v262_v33 = vld [vmem:[%s1738_s12 + $0x78] sm:$0xff]  ;;  %v263_v35 = vld [vmem:[%s1738_s12 + $0x80] sm:$0xff]  ;;  %v264_v37 = vld [vmem:[%s1738_s12 + $0x88] sm:$0xff] }
  0x23   : > { %1450 = vmatmul.mubr.msk.f32.gmra.mrb[4].mxu1 %vm294_vm3, %v272_v14  ;;  %1422 = vmatprep.mubr.msk.f32.mxu0 %vm294_vm3, %v253_v15  ;;  %v282_v34 = vld [vmem:[%s1738_s12 + $0x118] sm:$0xff]  ;;  %v283_v36 = vld [vmem:[%s1738_s12 + $0x120] sm:$0xff]  ;;  %v284_v38 = vld [vmem:[%s1738_s12 + $0x128] sm:$0xff] }
  0x24   : > { %1452 = vmatprep.mubr.msk.f32.mxu1 %vm294_vm3, %v273_v16  ;;  %v265_v39 = vld [vmem:[%s1738_s12 + $0x90] sm:$0xff]  ;;  %v266_v40 = vld [vmem:[%s1738_s12 + $0x98] sm:$0xff] }
  0x26   : > { %1423 = vmatmul.mubr.msk.f32.gmra.mrb[6].mxu0 %vm294_vm3, %v254_v17 }
  0x27   : > { %1453 = vmatmul.mubr.msk.f32.gmra.mrb[6].mxu1 %vm294_vm3, %v274_v18  ;;  %1425 = vmatprep.mubr.msk.f32.mxu0 %vm294_vm3, %v255_v19 }
  0x28   : > { %1455 = vmatprep.mubr.msk.f32.mxu1 %vm294_vm3, %v275_v20 }
  0x2a   : > { %1426 = vmatmul.mubr.msk.f32.gmra.mrb[8].mxu0 %vm294_vm3, %v256_v21 }
  0x2b   : > { %1456 = vmatmul.mubr.msk.f32.gmra.mrb[8].mxu1 %vm294_vm3, %v276_v22  ;;  %1428 = vmatprep.mubr.msk.f32.mxu0 %vm294_vm3, %v257_v23 }
  0x2c   : > { %1458 = vmatprep.mubr.msk.f32.mxu1 %vm294_vm3, %v277_v24 }
  0x2e   : > { %1429 = vmatmul.mubr.msk.f32.gmra.mrb[10].mxu0 %vm294_vm3, %v258_v25 }
  0x2f   : > { %1459 = vmatmul.mubr.msk.f32.gmra.mrb[10].mxu1 %vm294_vm3, %v278_v26  ;;  %1431 = vmatprep.mubr.msk.f32.mxu0 %vm294_vm3, %v259_v27 }
  0x30   : > { %1461 = vmatprep.mubr.msk.f32.mxu1 %vm294_vm3, %v279_v28 }
  0x32   : > { %1432 = vmatmul.mubr.msk.f32.gmra.mrb[12].mxu0 %vm294_vm3, %v260_v29 }
  0x33   : > { %1462 = vmatmul.mubr.msk.f32.gmra.mrb[12].mxu1 %vm294_vm3, %v280_v30  ;;  %1434 = vmatprep.mubr.msk.f32.mxu0 %vm294_vm3, %v261_v31 }
  0x34   : > { %1464 = vmatprep.mubr.msk.f32.mxu1 %vm294_vm3, %v281_v32 }
  0x36   : > { %1435 = vmatmul.mubr.msk.f32.gmra.mrb[14].mxu0 %vm294_vm3, %v262_v33 }
  0x37   : > { %1465 = vmatmul.mubr.msk.f32.gmra.mrb[14].mxu1 %vm294_vm3, %v282_v34  ;;  %1437 = vmatprep.mubr.msk.f32.mxu0 %vm294_vm3, %v263_v35 }
  0x38   : > { %1467 = vmatprep.mubr.msk.f32.mxu1 %vm294_vm3, %v283_v36 }
  0x3a   : > { %1438 = vmatmul.mubr.msk.f32.gmra.mrb[16].mxu0 %vm294_vm3, %v264_v37 }
  0x3b   : > { %1468 = vmatmul.mubr.msk.f32.gmra.mrb[16].mxu1 %vm294_vm3, %v284_v38  ;;  %1440 = vmatprep.mubr.msk.f32.mxu0 %vm294_vm3, %v265_v39 }
  0x3e   : > { %1441 = vmatmul.mubr.msk.f32.gmra.mrb[18].mxu0 %vm294_vm3, %v266_v40 }
  0xed   : > { %v1415_v42 = vpop.f32.mrb[0].mxu0 }
  0xee   : > { %v1445_v43 = vpop.f32.mrb[0].mxu1  ;;  %v485_v44 = vadd.f32 %v1415_v42, %v1819_v41  ;;  %v479_v46 = vpop.f32.mrb[1].mxu0 }
  0xef   : > { %v585_v45 = vadd.f32 %v1445_v43, %v1819_v41  ;;  %v579_v47 = vpop.f32.mrb[1].mxu1  ;;  %v480_v48 = vadd.f32 %v1819_v41, %v479_v46 }
  0xf0   : > { %v580_v49 = vadd.f32 %v1819_v41, %v579_v47  ;;  %v669_v51 = vmax.f32 %v485_v44, 0.0 }
  0xf1   : > { %v689_v52 = vmax.f32 %v585_v45, 0.0  ;;  %v668_v53 = vmax.f32 %v480_v48, 0.0  ;;  %v1418_v54 = vpop.f32.mrb[2].mxu0 }
  0xf2   : > { %v1448_v55 = vpop.f32.mrb[2].mxu1  ;;  %v495_v56 = vadd.f32 %v1418_v54, %v1819_v41  ;;  %v489_v57 = vpop.f32.mrb[3].mxu0  ;;  %v714_v61 = vmul.f32 %v1828_v50, %v669_v51  ;;  %v688_v62 = vmax.f32 %v580_v49, 0.0 }
  0xf3   : > { %v595_v58 = vadd.f32 %v1448_v55, %v1819_v41  ;;  %v734_v59 = vmul.f32 %v1828_v50, %v689_v52  ;;  %v589_v60 = vpop.f32.mrb[3].mxu1  ;;  %v490_v63 = vadd.f32 %v1819_v41, %v489_v57  ;;  %v713_v1 = vmul.f32 %v1828_v50, %v668_v53 }
  0xf4   : > { %v590_v0 = vadd.f32 %v1819_v41, %v589_v60  ;;  %v671_v2 = vmax.f32 %v495_v56, 0.0  ;;  %v755_v5 = vsel %vm751_vm4, %v714_v61, 0.0  ;;  %v733_v14 = vmul.f32 %v1828_v50, %v688_v62 }
  0xf5   : > { %v691_v3 = vmax.f32 %v595_v58, 0.0  ;;  %v815_v4 = vsel %vm751_vm4, %v734_v59, 0.0  ;;  %756 = vadd.xlane.f32.xlu0 %v755_v5  ;;  %v1421_v6 = vpop.f32.mrb[4].mxu0  ;;  %v670_v15 = vmax.f32 %v490_v63, 0.0  ;;  %v752_v18 = vsel %vm751_vm4, %v713_v1, 0.0 }
  0xf6   : > { %816 = vadd.xlane.f32.xlu1 %v815_v4  ;;  %v1451_v7 = vpop.f32.mrb[4].mxu1  ;;  %v716_v8 = vmul.f32 %v1828_v50, %v671_v2  ;;  %v505_v9 = vadd.f32 %v1421_v6, %v1819_v41  ;;  %v499_v10 = vpop.f32.mrb[5].mxu0  ;;  %v690_v16 = vmax.f32 %v590_v0, 0.0  ;;  %v812_v28 = vsel %vm751_vm4, %v733_v14, 0.0 }
  0xf7   : > { %v736_v11 = vmul.f32 %v1828_v50, %v691_v3  ;;  %v599_v12 = vpop.f32.mrb[5].mxu1  ;;  %v500_v13 = vadd.f32 %v1819_v41, %v499_v10  ;;  %v605_v19 = vadd.f32 %v1451_v7, %v1819_v41  ;;  %v715_v29 = vmul.f32 %v1828_v50, %v670_v15 }
  0xf8   : > { %v761_v17 = vsel %vm751_vm4, %v716_v8, 0.0  ;;  %v600_v20 = vadd.f32 %v1819_v41, %v599_v12  ;;  %v673_v23 = vmax.f32 %v505_v9, 0.0  ;;  %v735_v30 = vmul.f32 %v1828_v50, %v690_v16 }
  0xf9   : > { %753 = vadd.xlane.f32.xlu0 %v752_v18  ;;  %v1424_v21 = vpop.f32.mrb[6].mxu0  ;;  %v672_v24 = vmax.f32 %v500_v13, 0.0  ;;  %v821_v25 = vsel %vm751_vm4, %v736_v11, 0.0  ;;  %v693_v31 = vmax.f32 %v605_v19, 0.0  ;;  %v758_v42 = vsel %vm751_vm4, %v715_v29, 0.0 }
  0xfa   : > { %762 = vadd.xlane.f32.xlu1 %v761_v17  ;;  %v1454_v22 = vpop.f32.mrb[6].mxu1  ;;  %v509_v26 = vpop.f32.mrb[7].mxu0  ;;  %v692_v32 = vmax.f32 %v600_v20, 0.0  ;;  %v515_v35 = vadd.f32 %v1424_v21, %v1819_v41  ;;  %v718_v37 = vmul.f32 %v1828_v50, %v673_v23  ;;  %v818_v43 = vsel %vm751_vm4, %v735_v30, 0.0 }
  0xfb   : > { %v609_v27 = vpop.f32.mrb[7].mxu1  ;;  %v510_v36 = vadd.f32 %v1819_v41, %v509_v26  ;;  %v717_v38 = vmul.f32 %v1828_v50, %v672_v24  ;;  %v615_v44 = vadd.f32 %v1454_v22, %v1819_v41  ;;  %v738_v46 = vmul.f32 %v1828_v50, %v693_v31 }
  0xfc   : > { %v610_v45 = vadd.f32 %v1819_v41, %v609_v27  ;;  %v737_v47 = vmul.f32 %v1828_v50, %v692_v32  ;;  %v675_v51 = vmax.f32 %v515_v35, 0.0  ;;  %v767_v53 = vsel %vm751_vm4, %v718_v37, 0.0 }
  0xfd   : > { %813 = vadd.xlane.f32.xlu0 %v812_v28  ;;  %v1427_v33 = vpop.f32.mrb[8].mxu0  ;;  %v674_v52 = vmax.f32 %v510_v36, 0.0  ;;  %v764_v54 = vsel %vm751_vm4, %v717_v38, 0.0  ;;  %v695_v58 = vmax.f32 %v615_v44, 0.0  ;;  %v827_v60 = vsel %vm751_vm4, %v738_v46, 0.0 }
  0xfe   : > { %822 = vadd.xlane.f32.xlu1 %v821_v25  ;;  %v1457_v34 = vpop.f32.mrb[8].mxu1  ;;  %v519_v39 = vpop.f32.mrb[9].mxu0  ;;  %v525_v57 = vadd.f32 %v1427_v33, %v1819_v41  ;;  %v694_v59 = vmax.f32 %v610_v45, 0.0  ;;  %v824_v0 = vsel %vm751_vm4, %v737_v47, 0.0  ;;  %v720_v2 = vmul.f32 %v1828_v50, %v675_v51 }
  0xff   : > { %v619_v40 = vpop.f32.mrb[9].mxu1  ;;  %v625_v61 = vadd.f32 %v1457_v34, %v1819_v41  ;;  %v520_v1 = vadd.f32 %v1819_v41, %v519_v39  ;;  %v719_v3 = vmul.f32 %v1828_v50, %v674_v52  ;;  %v740_v9 = vmul.f32 %v1828_v50, %v695_v58 }
 0x100   : > { %v620_v6 = vadd.f32 %v1819_v41, %v619_v40  ;;  %v677_v7 = vmax.f32 %v525_v57, 0.0  ;;  %v739_v10 = vmul.f32 %v1828_v50, %v694_v59  ;;  %v773_v14 = vsel %vm751_vm4, %v720_v2, 0.0 }
 0x101   : > { %819 = vadd.xlane.f32.xlu0 %v818_v43  ;;  %v1430_v48 = vpop.f32.mrb[10].mxu0  ;;  %v697_v8 = vmax.f32 %v625_v61, 0.0  ;;  %v676_v13 = vmax.f32 %v520_v1, 0.0  ;;  %v770_v15 = vsel %vm751_vm4, %v719_v3, 0.0  ;;  %v833_v22 = vsel %vm751_vm4, %v740_v9, 0.0 }
 0x102   : > { %759 = vadd.xlane.f32.xlu1 %v758_v42  ;;  %v1460_v49 = vpop.f32.mrb[10].mxu1  ;;  %v529_v55 = vpop.f32.mrb[11].mxu0  ;;  %v696_v18 = vmax.f32 %v620_v6, 0.0  ;;  %v535_v19 = vadd.f32 %v1430_v48, %v1819_v41  ;;  %v722_v20 = vmul.f32 %v1828_v50, %v677_v7  ;;  %v830_v23 = vsel %vm751_vm4, %v739_v10, 0.0 }
 0x103   : > { %v629_v56 = vpop.f32.mrb[11].mxu1  ;;  %v635_v21 = vadd.f32 %v1460_v49, %v1819_v41  ;;  %v530_v24 = vadd.f32 %v1819_v41, %v529_v55  ;;  %v742_v25 = vmul.f32 %v1828_v50, %v697_v8  ;;  %v721_v28 = vmul.f32 %v1828_v50, %v676_v13 }
 0x104   : > { %v630_v29 = vadd.f32 %v1819_v41, %v629_v56  ;;  %v679_v34 = vmax.f32 %v535_v19, 0.0  ;;  %v741_v35 = vmul.f32 %v1828_v50, %v696_v18  ;;  %v779_v38 = vsel %vm751_vm4, %v722_v20, 0.0 }
 0x105   : > { %765 = vadd.xlane.f32.xlu0 %v764_v54  ;;  %v1867_v62 = vpop.f32.mrb[12].mxu0  ;;  %v699_v39 = vmax.f32 %v635_v21, 0.0  ;;  %v678_v43 = vmax.f32 %v530_v24, 0.0  ;;  %v839_v44 = vsel %vm751_vm4, %v742_v25, 0.0  ;;  %v776_v48 = vsel %vm751_vm4, %v721_v28, 0.0 }
 0x106   : > { %768 = vadd.xlane.f32.xlu1 %v767_v53  ;;  %v1869_v63 = vpop.f32.mrb[12].mxu1  ;;  %v1875_v4 = vpop.f32.mrb[13].mxu0  ;;  %v698_v54 = vmax.f32 %v630_v29, 0.0  ;;  %v836_v58 = vsel %vm751_vm4, %v741_v35, 0.0  ;;  %v724_v7 = vmul.f32 %v1828_v50, %v679_v34 }
 0x107   : > { %v1877_v5 = vpop.f32.mrb[13].mxu1  ;;  %v540_v6 = vadd.f32 %v1819_v41, %v1875_v4  ;;  %v723_v8 = vmul.f32 %v1828_v50, %v678_v43  ;;  %v645_v13 = vadd.f32 %v1869_v63, %v1819_v41  ;;  %v744_v4 = vmul.f32 %v1828_v50, %v699_v39 }
 0x108   : > { %v785_v21 = vsel %vm751_vm4, %v724_v7, 0.0 }
 0x109   : > { %825 = vadd.xlane.f32.xlu0 %v824_v0  ;;  %v1882_v11 = vpop.f32.mrb[14].mxu0  ;;  %v545_v0 = vadd.f32 %v1867_v62, %v1819_v41  ;;  %v680_v20 = vmax.f32 %v540_v6, 0.0  ;;  %v701_v63 = vmax.f32 %v645_v13, 0.0  ;;  %v845_v24 = vsel %vm751_vm4, %v744_v4, 0.0 }
 0x10a   : > { %828 = vadd.xlane.f32.xlu1 %v827_v60  ;;  %v1884_v12 = vpop.f32.mrb[14].mxu1  ;;  %v1888_v16 = vpop.f32.mrb[15].mxu0  ;;  %v555_v25 = vadd.f32 %v1882_v11, %v1819_v41 }
 0x10b   : > { %v1890_v17 = vpop.f32.mrb[15].mxu1  ;;  %v681_v19 = vmax.f32 %v545_v0, 0.0  ;;  %v725_v28 = vmul.f32 %v1828_v50, %v680_v20  ;;  %v655_v29 = vadd.f32 %v1884_v12, %v1819_v41 }
 0x10c   : > { %v683_v11 = vmax.f32 %v555_v25, 0.0 }
 0x10d   : > { %771 = vadd.xlane.f32.xlu0 %v770_v15  ;;  %v1439_v26 = vpop.f32.mrb[16].mxu0  ;;  %v743_v15 = vmul.f32 %v1828_v50, %v698_v54  ;;  %v788_v34 = vsel %vm751_vm4, %v725_v28, 0.0  ;;  %v703_v35 = vmax.f32 %v655_v29, 0.0 }
 0x10e   : > { %774 = vadd.xlane.f32.xlu1 %v773_v14  ;;  %v1469_v27 = vpop.f32.mrb[16].mxu1  ;;  %v565_v30 = vadd.f32 %v1439_v26, %v1819_v41  ;;  %v559_v31 = vpop.f32.mrb[17].mxu0  ;;  %v640_v14 = vadd.f32 %v1819_v41, %v1877_v5  ;;  %v550_v26 = vadd.f32 %v1819_v41, %v1888_v16 }
 0x10f   : > { %v665_v32 = vadd.f32 %v1469_v27, %v1819_v41  ;;  %v659_v33 = vpop.f32.mrb[17].mxu1  ;;  %v560_v36 = vadd.f32 %v1819_v41, %v559_v31  ;;  %v842_v5 = vsel %vm751_vm4, %v743_v15, 0.0  ;;  %v726_v27 = vmul.f32 %v1828_v50, %v681_v19 }
 0x110   : > { %v660_v37 = vadd.f32 %v1819_v41, %v659_v33  ;;  %v685_v40 = vmax.f32 %v565_v30, 0.0  ;;  %v650_v30 = vadd.f32 %v1819_v41, %v1890_v17  ;;  %v746_v31 = vmul.f32 %v1828_v50, %v701_v63 }
 0x111   : > { %v705_v42 = vmax.f32 %v665_v32, 0.0  ;;  %831 = vadd.xlane.f32.xlu0 %v830_v23  ;;  %v684_v45 = vmax.f32 %v560_v36, 0.0  ;;  %v1442_v46 = vpop.f32.mrb[18].mxu0  ;;  %v700_v23 = vmax.f32 %v640_v14, 0.0  ;;  %v682_v33 = vmax.f32 %v550_v26, 0.0 }
 0x112   : > { %834 = vadd.xlane.f32.xlu1 %v833_v22  ;;  %v704_v47 = vmax.f32 %v660_v37, 0.0  ;;  %v575_v49 = vadd.f32 %v1442_v46, %v1819_v41  ;;  %v569_v51 = vpop.f32.mrb[19].mxu0  ;;  %v730_v52 = vmul.f32 %v1828_v50, %v685_v40  ;;  %v782_v22 = vsel %vm751_vm4, %v723_v8, 0.0 }
 0x113   : > { %v750_v53 = vmul.f32 %v1828_v50, %v705_v42  ;;  %v570_v55 = vadd.f32 %v1819_v41, %v569_v51  ;;  %v729_v56 = vmul.f32 %v1828_v50, %v684_v45  ;;  %v745_v32 = vmul.f32 %v1828_v50, %v700_v23 }
 0x114   : > { %v749_v57 = vmul.f32 %v1828_v50, %v704_v47  ;;  %v687_v59 = vmax.f32 %v575_v49, 0.0  ;;  %v1917_v60 = vsel %vm751_vm4, %v730_v52, 0.0  ;;  %v791_v16 = vsel %vm751_vm4, %v726_v27, 0.0 }
 0x115   : > { %v1920_v61 = vsel %vm751_vm4, %v750_v53, 0.0  ;;  %777 = vadd.xlane.f32.xlu0 %v776_v48  ;;  %v686_v1 = vmax.f32 %v570_v55, 0.0  ;;  %v800_v2 = vsel %vm751_vm4, %v729_v56, 0.0  ;;  %v851_v12 = vsel %vm751_vm4, %v746_v31, 0.0 }
 0x116   : > { %780 = vadd.xlane.f32.xlu1 %v779_v38  ;;  %v860_v3 = vsel %vm751_vm4, %v749_v57, 0.0  ;;  %v732_v9 = vmul.f32 %v1828_v50, %v687_v59  ;;  %v702_v36 = vmax.f32 %v650_v30, 0.0  ;;  %v848_v37 = vsel %vm751_vm4, %v745_v32, 0.0 }
 0x117   : > { %v731_v10 = vmul.f32 %v1828_v50, %v686_v1  ;;  %v728_v41 = vmul.f32 %v1828_v50, %v683_v11  ;;  %v727_v17 = vmul.f32 %v1828_v50, %v682_v33  ;;  %v748_v40 = vmul.f32 %v1828_v50, %v703_v35 }
 0x118   : > { %v809_v62 = vsel %vm751_vm4, %v732_v9, 0.0  ;;  %v747_v42 = vmul.f32 %v1828_v50, %v702_v36  ;;  %v1971_v50 = vstv %s866_s17 }
 0x119   : > { %837 = vadd.xlane.f32.xlu0 %v836_v58  ;;  %v806_v18 = vsel %vm751_vm4, %v731_v10, 0.0  ;;  %v797_v38 = vsel %vm751_vm4, %v728_v41, 0.0  ;;  %v794_v39 = vsel %vm751_vm4, %v727_v17, 0.0  ;;  %v857_v43 = vsel %vm751_vm4, %v748_v40, 0.0 }
 0x11a   : > { %840 = vadd.xlane.f32.xlu1 %v839_v44  ;;  %v854_v44 = vsel %vm751_vm4, %v747_v42, 0.0 }
 0x11d   : > { %783 = vadd.xlane.f32.xlu0 %v782_v22 }
 0x11e   : > { %786 = vadd.xlane.f32.xlu1 %v785_v21 }
 0x121   : > { %843 = vadd.xlane.f32.xlu0 %v842_v5 }
 0x122   : > { %846 = vadd.xlane.f32.xlu1 %v845_v24 }
 0x125   : > { %789 = vadd.xlane.f32.xlu0 %v788_v34 }
 0x126   : > { %792 = vadd.xlane.f32.xlu1 %v791_v16 }
 0x129   : > { %849 = vadd.xlane.f32.xlu0 %v848_v37 }
 0x12a   : > { %852 = vadd.xlane.f32.xlu1 %v851_v12 }
 0x12d   : > { %795 = vadd.xlane.f32.xlu0 %v794_v39 }
 0x12e   : > { %798 = vadd.xlane.f32.xlu1 %v797_v38 }
 0x131   : > { %855 = vadd.xlane.f32.xlu0 %v854_v44 }
 0x132   : > { %858 = vadd.xlane.f32.xlu1 %v857_v43 }
 0x135   : > { %801 = vadd.xlane.f32.xlu0 %v800_v2 }
 0x136   : > { %804 = vadd.xlane.f32.xlu1 %v1917_v60 }
 0x139   : > { %807 = vadd.xlane.f32.xlu0 %v806_v18 }
 0x13a   : > { %810 = vadd.xlane.f32.xlu1 %v809_v62 }
 0x13d   : > { %861 = vadd.xlane.f32.xlu0 %v860_v3 }
 0x13e   : > { %864 = vadd.xlane.f32.xlu1 %v1920_v61 }
 0x182   : > { %v757_v46 = vpop.xlane.xlu0 %756 }
 0x183   : > { %v817_v45 = vpop.xlane.xlu1 %816  ;;  %v869_v48 = vadd.f32 %v1971_v50, %v757_v46 }
 0x184   : > { %v889_v47 = vadd.f32 %v1971_v50, %v817_v45 }
 0x185   : > { %908 = vst.msk [vmem:[%s1975_s22 + $0x8] sm:$0xff] %vm906_vm5, %v869_v48 }
 0x186   : > { %928 = vst.msk [vmem:[%s1975_s22 + $0xa8] sm:$0xff] %vm906_vm5, %v889_v47  ;;  %v754_v51 = vpop.xlane.xlu0 %753 }
 0x187   : > { %v763_v49 = vpop.xlane.xlu1 %762  ;;  %v868_v53 = vadd.f32 %v1971_v50, %v754_v51 }
 0x188   : > { %v871_v52 = vadd.f32 %v1971_v50, %v763_v49 }
 0x189   : > { %907 = vst.msk [vmem:[%s1975_s22] sm:$0xff] %vm906_vm5, %v868_v53 }
 0x18a   : > { %910 = vst.msk [vmem:[%s1975_s22 + $0x18] sm:$0xff] %vm906_vm5, %v871_v52  ;;  %v814_v55 = vpop.xlane.xlu0 %813 }
 0x18b   : > { %v823_v54 = vpop.xlane.xlu1 %822  ;;  %v888_v57 = vadd.f32 %v1971_v50, %v814_v55 }
 0x18c   : > { %v891_v56 = vadd.f32 %v1971_v50, %v823_v54 }
 0x18d   : > { %927 = vst.msk [vmem:[%s1975_s22 + $0xa0] sm:$0xff] %vm906_vm5, %v888_v57 }
 0x18e   : > { %930 = vst.msk [vmem:[%s1975_s22 + $0xb8] sm:$0xff] %vm906_vm5, %v891_v56  ;;  %v820_v59 = vpop.xlane.xlu0 %819 }
 0x18f   : > { %v760_v58 = vpop.xlane.xlu1 %759  ;;  %v890_v61 = vadd.f32 %v1971_v50, %v820_v59 }
 0x190   : > { %v870_v60 = vadd.f32 %v1971_v50, %v760_v58 }
 0x191   : > { %929 = vst.msk [vmem:[%s1975_s22 + $0xb0] sm:$0xff] %vm906_vm5, %v890_v61 }
 0x192   : > { %909 = vst.msk [vmem:[%s1975_s22 + $0x10] sm:$0xff] %vm906_vm5, %v870_v60  ;;  %v766_v1 = vpop.xlane.xlu0 %765 }
 0x193   : > { %v769_v0 = vpop.xlane.xlu1 %768  ;;  %v872_v3 = vadd.f32 %v1971_v50, %v766_v1 }
 0x194   : > { %v873_v2 = vadd.f32 %v1971_v50, %v769_v0 }
 0x195   : > { %911 = vst.msk [vmem:[%s1975_s22 + $0x20] sm:$0xff] %vm906_vm5, %v872_v3 }
 0x196   : > { %912 = vst.msk [vmem:[%s1975_s22 + $0x28] sm:$0xff] %vm906_vm5, %v873_v2  ;;  %v826_v7 = vpop.xlane.xlu0 %825 }
 0x197   : > { %v829_v6 = vpop.xlane.xlu1 %828  ;;  %v892_v9 = vadd.f32 %v1971_v50, %v826_v7 }
 0x198   : > { %v893_v8 = vadd.f32 %v1971_v50, %v829_v6 }
 0x199   : > { %931 = vst.msk [vmem:[%s1975_s22 + $0xc0] sm:$0xff] %vm906_vm5, %v892_v9 }
 0x19a   : > { %932 = vst.msk [vmem:[%s1975_s22 + $0xc8] sm:$0xff] %vm906_vm5, %v893_v8  ;;  %v772_v13 = vpop.xlane.xlu0 %771 }
 0x19b   : > { %v775_v10 = vpop.xlane.xlu1 %774  ;;  %v874_v14 = vadd.f32 %v1971_v50, %v772_v13 }
 0x19c   : > { %v875_v62 = vadd.f32 %v1971_v50, %v775_v10 }
 0x19d   : > { %913 = vst.msk [vmem:[%s1975_s22 + $0x30] sm:$0xff] %vm906_vm5, %v874_v14 }
 0x19e   : > { %914 = vst.msk [vmem:[%s1975_s22 + $0x38] sm:$0xff] %vm906_vm5, %v875_v62  ;;  %v832_v15 = vpop.xlane.xlu0 %831 }
 0x19f   : > { %v835_v4 = vpop.xlane.xlu1 %834  ;;  %v894_v19 = vadd.f32 %v1971_v50, %v832_v15 }
 0x1a0   : > { %v895_v18 = vadd.f32 %v1971_v50, %v835_v4 }
 0x1a1   : > { %933 = vst.msk [vmem:[%s1975_s22 + $0xd0] sm:$0xff] %vm906_vm5, %v894_v19 }
 0x1a2   : > { %934 = vst.msk [vmem:[%s1975_s22 + $0xd8] sm:$0xff] %vm906_vm5, %v895_v18  ;;  %v778_v21 = vpop.xlane.xlu0 %777 }
 0x1a3   : > { %v781_v20 = vpop.xlane.xlu1 %780  ;;  %v876_v63 = vadd.f32 %v1971_v50, %v778_v21 }
 0x1a4   : > { %v877_v22 = vadd.f32 %v1971_v50, %v781_v20 }
 0x1a5   : > { %915 = vst.msk [vmem:[%s1975_s22 + $0x40] sm:$0xff] %vm906_vm5, %v876_v63 }
 0x1a6   : > { %916 = vst.msk [vmem:[%s1975_s22 + $0x48] sm:$0xff] %vm906_vm5, %v877_v22  ;;  %v838_v24 = vpop.xlane.xlu0 %837 }
 0x1a7   : > { %v841_v23 = vpop.xlane.xlu1 %840  ;;  %v896_v25 = vadd.f32 %v1971_v50, %v838_v24 }
 0x1a8   : > { %v897_v5 = vadd.f32 %v1971_v50, %v841_v23 }
 0x1a9   : > { %935 = vst.msk [vmem:[%s1975_s22 + $0xe0] sm:$0xff] %vm906_vm5, %v896_v25 }
 0x1aa   : > { %936 = vst.msk [vmem:[%s1975_s22 + $0xe8] sm:$0xff] %vm906_vm5, %v897_v5  ;;  %v784_v27 = vpop.xlane.xlu0 %783 }
 0x1ab   : > { %v787_v26 = vpop.xlane.xlu1 %786  ;;  %v878_v29 = vadd.f32 %v1971_v50, %v784_v27 }
 0x1ac   : > { %v879_v28 = vadd.f32 %v1971_v50, %v787_v26 }
 0x1ad   : > { %917 = vst.msk [vmem:[%s1975_s22 + $0x50] sm:$0xff] %vm906_vm5, %v878_v29 }
 0x1ae   : > { %918 = vst.msk [vmem:[%s1975_s22 + $0x58] sm:$0xff] %vm906_vm5, %v879_v28  ;;  %v844_v31 = vpop.xlane.xlu0 %843 }
 0x1af   : > { %v847_v30 = vpop.xlane.xlu1 %846  ;;  %v898_v11 = vadd.f32 %v1971_v50, %v844_v31 }
 0x1b0   : > { %v899_v32 = vadd.f32 %v1971_v50, %v847_v30 }
 0x1b1   : > { %937 = vst.msk [vmem:[%s1975_s22 + $0xf0] sm:$0xff] %vm906_vm5, %v898_v11 }
 0x1b2   : > { %938 = vst.msk [vmem:[%s1975_s22 + $0xf8] sm:$0xff] %vm906_vm5, %v899_v32  ;;  %v790_v16 = vpop.xlane.xlu0 %789 }
 0x1b3   : > { %v793_v33 = vpop.xlane.xlu1 %792  ;;  %v880_v35 = vadd.f32 %v1971_v50, %v790_v16 }
 0x1b4   : > { %v881_v34 = vadd.f32 %v1971_v50, %v793_v33 }
 0x1b5   : > { %919 = vst.msk [vmem:[%s1975_s22 + $0x60] sm:$0xff] %vm906_vm5, %v880_v35 }
 0x1b6   : > { %920 = vst.msk [vmem:[%s1975_s22 + $0x68] sm:$0xff] %vm906_vm5, %v881_v34  ;;  %v850_v36 = vpop.xlane.xlu0 %849 }
 0x1b7   : > { %v853_v12 = vpop.xlane.xlu1 %852  ;;  %v900_v41 = vadd.f32 %v1971_v50, %v850_v36 }
 0x1b8   : > { %v901_v37 = vadd.f32 %v1971_v50, %v853_v12 }
 0x1b9   : > { %939 = vst.msk [vmem:[%s1975_s22 + $0x100] sm:$0xff] %vm906_vm5, %v900_v41 }
 0x1ba   : > { %940 = vst.msk [vmem:[%s1975_s22 + $0x108] sm:$0xff] %vm906_vm5, %v901_v37  ;;  %v796_v38 = vpop.xlane.xlu0 %795 }
 0x1bb   : > { %v799_v17 = vpop.xlane.xlu1 %798  ;;  %v882_v40 = vadd.f32 %v1971_v50, %v796_v38 }
 0x1bc   : > { %v883_v39 = vadd.f32 %v1971_v50, %v799_v17 }
 0x1bd   : > { %921 = vst.msk [vmem:[%s1975_s22 + $0x70] sm:$0xff] %vm906_vm5, %v882_v40 }
 0x1be   : > { %922 = vst.msk [vmem:[%s1975_s22 + $0x78] sm:$0xff] %vm906_vm5, %v883_v39  ;;  %v856_v43 = vpop.xlane.xlu0 %855 }
 0x1bf   : > { %v859_v42 = vpop.xlane.xlu1 %858  ;;  %v902_v45 = vadd.f32 %v1971_v50, %v856_v43 }
 0x1c0   : > { %v903_v44 = vadd.f32 %v1971_v50, %v859_v42 }
 0x1c1   : > { %941 = vst.msk [vmem:[%s1975_s22 + $0x110] sm:$0xff] %vm906_vm5, %v902_v45 }
 0x1c2   : > { %942 = vst.msk [vmem:[%s1975_s22 + $0x118] sm:$0xff] %vm906_vm5, %v903_v44  ;;  %v802_v47 = vpop.xlane.xlu0 %801 }
 0x1c3   : > { %v805_v46 = vpop.xlane.xlu1 %804  ;;  %v884_v49 = vadd.f32 %v1971_v50, %v802_v47 }
 0x1c4   : > { %v885_v48 = vadd.f32 %v1971_v50, %v805_v46 }
 0x1c5   : > { %923 = vst.msk [vmem:[%s1975_s22 + $0x80] sm:$0xff] %vm906_vm5, %v884_v49 }
 0x1c6   : > { %924 = vst.msk [vmem:[%s1975_s22 + $0x88] sm:$0xff] %vm906_vm5, %v885_v48  ;;  %v808_v52 = vpop.xlane.xlu0 %807 }
 0x1c7   : > { %v811_v51 = vpop.xlane.xlu1 %810  ;;  %v886_v54 = vadd.f32 %v1971_v50, %v808_v52 }
 0x1c8   : > { %v887_v53 = vadd.f32 %v1971_v50, %v811_v51  ;;  %951 = sbr.rel (!%p1720_p4) target bundleno = 534 (0x216), region = 44 }
 0x1c9   : > { %925 = vst.msk [vmem:[%s1975_s22 + $0x90] sm:$0xff] %vm906_vm5, %v886_v54 }
 0x1ca   : > { %926 = vst.msk [vmem:[%s1975_s22 + $0x98] sm:$0xff] %vm906_vm5, %v887_v53  ;;  %v862_v56 = vpop.xlane.xlu0 %861 }
 0x1cb   : > { %v865_v55 = vpop.xlane.xlu1 %864  ;;  %v904_v58 = vadd.f32 %v1971_v50, %v862_v56 }
 0x1cc   : > { %v905_v57 = vadd.f32 %v1971_v50, %v865_v55 }
 0x1cd   : > { %943 = vst.msk [vmem:[%s1975_s22 + $0x120] sm:$0xff] %vm906_vm5, %v904_v58 }
 0x1ce   : > { %944 = vst.msk [vmem:[%s1975_s22 + $0x128] sm:$0xff] %vm906_vm5, %v905_v57 }
 0x1cf   : > { %s2254_s20 = smov (!%p954_p8, %s953_s20), 38 }
 0x1d0   : > { %s1356_s30 = sshll.u32 %s2254_s20, 7 }
 0x1d1   : > { %p1359_p9 = scmp.eq.s32.totalorder %s1356_s30, 0 }
 0x1d2   : > { %1569 = sdivrem.u32 (!%p1359_p9), %s2254_s20, 38 }
 0x1d3   : > { %962 = sbr.rel (%p1359_p9) target bundleno = 534 (0x216), region = 48 }
 0x1db   : > { %s2102_s27 = spop.drf %1569 }
 0x1dc   : > { %p1360_p10 = scmp.le.s32.totalorder %s2102_s27, 0 }
 0x1dd   : > { %s2245_s4 = smov (!%p1360_p10), %s2096_s29  ;;  %s2246_s6 = smov (!%p1360_p10), %s1975_s22 }
 0x1de   : > { %1266 = sbr.rel (%p1360_p10) target bundleno = 505 (0x1f9), region = 124  ;;  %s2111_s7 = smov (!%p1360_p10), 0  }
 0x1df   : > { %s2113_s8 = smov (!%p1360_p10), 0  }
 0x1e5 LB: >> { %v1100_v50 = vld [vmem:[%s1635_s6] sm:$0xff]  ;;  %v1102_v59 = vld [vmem:[%s1635_s6 + $0x8] sm:$0xff]  ;;  %v1104_v60 = vld [vmem:[%s1635_s6 + $0x10] sm:$0xff]  ;;  %s1176_s9 = sadd.s32 1, %s1639_s7  ;;  %s1094_s8 = sadd.s32 1, %s1643_s8   ;;  %s1643_s8 = sphi %s2113_s8, %s1094_s8   ;;  %s1639_s7 = sphi %s2111_s7, %s2249_s7   ;;  %s1635_s6 = sphi %s2246_s6, %s2248_s6   ;;  %s1631_s4 = sphi %s2245_s4, %s2247_s4  }
 0x1e6   : >> { %1101 = vst [vmem:[%s1631_s4] sm:$0xff] %v1100_v50  ;;  %1103 = vst [vmem:[%s1631_s4 + $0x8] sm:$0xff] %v1102_v59  ;;  %v1106_v61 = vld [vmem:[%s1635_s6 + $0x18] sm:$0xff]  ;;  %v1108_v0 = vld [vmem:[%s1635_s6 + $0x20] sm:$0xff]  ;;  %p1177_p11 = scmp.ge.s32.totalorder %s1176_s9, %s2102_s27  ;;  %p1093_p12 = scmp.ge.s32.totalorder %s1094_s8, %s2102_s27 }
 0x1e7   : >> { %1105 = vst [vmem:[%s1631_s4 + $0x10] sm:$0xff] %v1104_v60  ;;  %v1110_v1 = vld [vmem:[%s1635_s6 + $0x28] sm:$0xff]  ;;  %1107 = vst [vmem:[%s1631_s4 + $0x18] sm:$0xff] %v1106_v61  ;;  %v1112_v2 = vld [vmem:[%s1635_s6 + $0x30] sm:$0xff] }
 0x1e8   : >> { %1109 = vst [vmem:[%s1631_s4 + $0x20] sm:$0xff] %v1108_v0  ;;  %1111 = vst [vmem:[%s1631_s4 + $0x28] sm:$0xff] %v1110_v1  ;;  %v1114_v3 = vld [vmem:[%s1635_s6 + $0x38] sm:$0xff]  ;;  %v1116_v6 = vld [vmem:[%s1635_s6 + $0x40] sm:$0xff]  ;;  %s2256_s9 = smov (%p1177_p11, %s1176_s9), 0 }
 0x1e9   : >> { %1113 = vst [vmem:[%s1631_s4 + $0x30] sm:$0xff] %v1112_v2  ;;  %1115 = vst [vmem:[%s1631_s4 + $0x38] sm:$0xff] %v1114_v3  ;;  %v1118_v7 = vld [vmem:[%s1635_s6 + $0x48] sm:$0xff]  ;;  %v1120_v8 = vld [vmem:[%s1635_s6 + $0x50] sm:$0xff]  ;;  %s1179_s10 = smul.u32 304, %s2256_s9  ;;  %s2249_s7 = smov %s2256_s9 }
 0x1ea   : >> { %1117 = vst [vmem:[%s1631_s4 + $0x40] sm:$0xff] %v1116_v6  ;;  %v1122_v9 = vld [vmem:[%s1635_s6 + $0x58] sm:$0xff]  ;;  %1119 = vst [vmem:[%s1631_s4 + $0x48] sm:$0xff] %v1118_v7  ;;  %v1124_v10 = vld [vmem:[%s1635_s6 + $0x60] sm:$0xff] }
 0x1eb   : >> { %1121 = vst [vmem:[%s1631_s4 + $0x50] sm:$0xff] %v1120_v8  ;;  %1123 = vst [vmem:[%s1631_s4 + $0x58] sm:$0xff] %v1122_v9  ;;  %v1126_v13 = vld [vmem:[%s1635_s6 + $0x68] sm:$0xff]  ;;  %v1128_v62 = vld [vmem:[%s1635_s6 + $0x70] sm:$0xff]  ;;  %s2175_s11 = scalar_lea.vmem %s1975_s22, %s1179_s10 [#allocation3]   ;;  %s2178_s12 = scalar_lea.vmem %s2096_s29, %s1179_s10  }
 0x1ec   : >> { %1125 = vst [vmem:[%s1631_s4 + $0x60] sm:$0xff] %v1124_v10  ;;  %1127 = vst [vmem:[%s1631_s4 + $0x68] sm:$0xff] %v1126_v13  ;;  %v1130_v14 = vld [vmem:[%s1635_s6 + $0x78] sm:$0xff]  ;;  %v1132_v4 = vld [vmem:[%s1635_s6 + $0x80] sm:$0xff] }
 0x1ed   : >> { %1129 = vst [vmem:[%s1631_s4 + $0x70] sm:$0xff] %v1128_v62  ;;  %v1134_v15 = vld [vmem:[%s1635_s6 + $0x88] sm:$0xff]  ;;  %1131 = vst [vmem:[%s1631_s4 + $0x78] sm:$0xff] %v1130_v14  ;;  %v1136_v18 = vld [vmem:[%s1635_s6 + $0x90] sm:$0xff] }
 0x1ee   : >> { %1133 = vst [vmem:[%s1631_s4 + $0x80] sm:$0xff] %v1132_v4  ;;  %1135 = vst [vmem:[%s1631_s4 + $0x88] sm:$0xff] %v1134_v15  ;;  %v1138_v19 = vld [vmem:[%s1635_s6 + $0x98] sm:$0xff]  ;;  %v1140_v20 = vld [vmem:[%s1635_s6 + $0xa0] sm:$0xff] }
 0x1ef   : >> { %1137 = vst [vmem:[%s1631_s4 + $0x90] sm:$0xff] %v1136_v18  ;;  %1139 = vst [vmem:[%s1631_s4 + $0x98] sm:$0xff] %v1138_v19  ;;  %v1142_v21 = vld [vmem:[%s1635_s6 + $0xa8] sm:$0xff]  ;;  %v1144_v22 = vld [vmem:[%s1635_s6 + $0xb0] sm:$0xff] }
 0x1f0   : >> { %1141 = vst [vmem:[%s1631_s4 + $0xa0] sm:$0xff] %v1140_v20  ;;  %v1146_v63 = vld [vmem:[%s1635_s6 + $0xb8] sm:$0xff]  ;;  %1143 = vst [vmem:[%s1631_s4 + $0xa8] sm:$0xff] %v1142_v21  ;;  %v1148_v23 = vld [vmem:[%s1635_s6 + $0xc0] sm:$0xff] }
 0x1f1   : >> { %1145 = vst [vmem:[%s1631_s4 + $0xb0] sm:$0xff] %v1144_v22  ;;  %1147 = vst [vmem:[%s1631_s4 + $0xb8] sm:$0xff] %v1146_v63  ;;  %v1150_v24 = vld [vmem:[%s1635_s6 + $0xc8] sm:$0xff]  ;;  %v1152_v5 = vld [vmem:[%s1635_s6 + $0xd0] sm:$0xff] }
 0x1f2   : >> { %1149 = vst [vmem:[%s1631_s4 + $0xc0] sm:$0xff] %v1148_v23  ;;  %1151 = vst [vmem:[%s1631_s4 + $0xc8] sm:$0xff] %v1150_v24  ;;  %v1154_v25 = vld [vmem:[%s1635_s6 + $0xd8] sm:$0xff]  ;;  %v1156_v26 = vld [vmem:[%s1635_s6 + $0xe0] sm:$0xff]  ;;  %1096 = sbr.rel (!%p1093_p12) target bundleno = 485 (0x1e5), region = 130 }
 0x1f3   : >> { %1153 = vst [vmem:[%s1631_s4 + $0xd0] sm:$0xff] %v1152_v5  ;;  %v1158_v27 = vld [vmem:[%s1635_s6 + $0xe8] sm:$0xff]  ;;  %1155 = vst [vmem:[%s1631_s4 + $0xd8] sm:$0xff] %v1154_v25  ;;  %v1160_v28 = vld [vmem:[%s1635_s6 + $0xf0] sm:$0xff] }
 0x1f4   : >> { %1157 = vst [vmem:[%s1631_s4 + $0xe0] sm:$0xff] %v1156_v26  ;;  %1159 = vst [vmem:[%s1631_s4 + $0xe8] sm:$0xff] %v1158_v27  ;;  %v1162_v29 = vld [vmem:[%s1635_s6 + $0xf8] sm:$0xff]  ;;  %v1164_v30 = vld [vmem:[%s1635_s6 + $0x100] sm:$0xff] }
 0x1f5   : >> { %1161 = vst [vmem:[%s1631_s4 + $0xf0] sm:$0xff] %v1160_v28  ;;  %1163 = vst [vmem:[%s1631_s4 + $0xf8] sm:$0xff] %v1162_v29  ;;  %v1166_v31 = vld [vmem:[%s1635_s6 + $0x108] sm:$0xff]  ;;  %v1168_v32 = vld [vmem:[%s1635_s6 + $0x110] sm:$0xff] }
 0x1f6   : >> { %1165 = vst [vmem:[%s1631_s4 + $0x100] sm:$0xff] %v1164_v30  ;;  %v1170_v11 = vld [vmem:[%s1635_s6 + $0x118] sm:$0xff]  ;;  %1167 = vst [vmem:[%s1631_s4 + $0x108] sm:$0xff] %v1166_v31  ;;  %v1172_v33 = vld [vmem:[%s1635_s6 + $0x120] sm:$0xff] }
 0x1f7   : >> { %1169 = vst [vmem:[%s1631_s4 + $0x110] sm:$0xff] %v1168_v32  ;;  %1171 = vst [vmem:[%s1631_s4 + $0x118] sm:$0xff] %v1170_v11  ;;  %v1174_v16 = vld [vmem:[%s1635_s6 + $0x128] sm:$0xff]  ;;  %s2248_s6 = smov %s2175_s11 }
 0x1f8   : >> { %1173 = vst [vmem:[%s1631_s4 + $0x120] sm:$0xff] %v1172_v33  ;;  %1175 = vst [vmem:[%s1631_s4 + $0x128] sm:$0xff] %v1174_v16  ;;  %s2247_s4 = smov %s2178_s12 }
 0x1f9 PF: > { %1571 = sdivrem.u32 %s2254_s20, 38 }
 0x1fa   : > { %s1361_s13 = smul.u32 304, %s2102_s27 }
 0x1fc   : > { %s1187_s14 = scalar_lea.vmem %s1975_s22, %s1361_s13 [#allocation3]   ;;  %s1189_s15 = scalar_lea.vmem %s2096_s29, %s1361_s13  }
 0x202   : > { %s1572_s16 = spop.drf %1571 }
 0x203   : > { %p1363_p13 = scmp.le.s32.totalorder %s1572_s16, 0 }
 0x204   : > { %s1645_s17 = smov (!%p1363_p13), %s1189_s15   ;;  %s1649_s18 = smov (!%p1363_p13), %s1187_s14  }
 0x205   : > { %1280 = sbr.rel (%p1363_p13) target bundleno = 534 (0x216), region = 135  ;;  %s1653_s19 = smov (!%p1363_p13), 0  }
 0x206   : > { %s1657_s24 = smov (!%p1363_p13), 0  }
 0x20c LB: >> { %v1199_v34 = vld [vmem:[%s1651_s18] sm:$0xff]  ;;  %s1201_s25 = sadd.s32 1, %s1655_s19  ;;  %s1193_s24 = sadd.s32 1, %s1659_s24   ;;  %s1659_s24 = sphi %s1657_s24, %s1193_s24   ;;  %s1655_s19 = sphi %s1653_s19, %s1654_s19   ;;  %s1651_s18 = sphi %s1649_s18, %s1206_s18   ;;  %s1647_s17 = sphi %s1645_s17, %s1207_s17  }
 0x20d   : >> { %1200 = vst [vmem:[%s1647_s17] sm:$0xff] %v1199_v34  ;;  %p1202_p0 = scmp.ge.s32.totalorder %s1201_s25, %s1572_s16  ;;  %p1192_p1 = scmp.ge.s32.totalorder %s1193_s24, %s1572_s16 }
 0x20f   : >> { %s2258_s25 = smov (%p1202_p0, %s1201_s25), 0  ;;  %1195 = sbr.rel (!%p1192_p1) target bundleno = 524 (0x20c), region = 141 }
 0x210   : >> { %s1364_s22 = sshll.u32 %s2258_s25, 3  ;;  %s1654_s19 = smov %s2258_s25  }
 0x211   : >> { %s1206_s18 = scalar_lea.vmem %s1187_s14, %s1364_s22 [#allocation3]   ;;  %s1207_s17 = scalar_lea.vmem %s1189_s15, %s1364_s22  }
 0x216 PF: > { %p13_p2 = scmp.ge.s32.totalorder %s1710_s23, 4   ;;  %s2250_s20 = smov %s1623_s21 }
 0x217   : > { %s2251_s21 = smov %s1718_s26  ;;  %s2252_s22 = smov %s1710_s23 }
 0x218   :  { %15 = sbr.rel (!%p13_p2) target bundleno = 4 (0x4), region = 152 }

</bundles_post_ra>
